<compile_context>
chip_gen: v5e
topology: v5e:2x2
jax: 0.10.0
libtpu: 0.0.40
codegen_flags: <defaults>
</compile_context>

<pallas_src>
import jax
import jax.numpy as jnp
from jax.experimental import pallas as pl
from jax.experimental.pallas import tpu as pltpu

_LANE = 128
_SUBLANE = 8


def _round_up(a, b):
    return (a + b - 1) // b * b


def pe_kernel(x_ref, p_ref, o_ref):
    # x_ref: (tm, d) tile of flattened inputs
    # p_ref: (d, Fp) full (lane-padded) encoding matrix
    # o_ref: (tm, 2*Fp) output tile: [sin(xP) | cos(xP)], both halves 128-aligned
    xp = jnp.dot(x_ref[...], p_ref[...], preferred_element_type=jnp.float32)
    Fp = p_ref.shape[1]
    o_ref[:, :Fp] = jnp.sin(xp).astype(o_ref.dtype)
    o_ref[:, Fp:] = jnp.cos(xp).astype(o_ref.dtype)


def _pick_tm(M, d, Fp, out_itemsize, vmem_budget=24 * 1024 * 1024):
    """Largest sublane-multiple row tile whose double-buffered working set
    (x tile, lane-padded to 128; out tile; resident P) fits the VMEM budget."""
    x_row = _round_up(d, _LANE) * 4            # f32 x tile row, lane-padded
    o_row = 2 * Fp * out_itemsize              # output tile row (lane-aligned)
    per_row = 2 * (x_row + o_row)              # 2x: double buffering
    p_bytes = 2 * _round_up(d, _SUBLANE) * Fp * 4
    avail = max(vmem_budget - p_bytes, per_row * _SUBLANE)
    tm = max(_SUBLANE, (avail // per_row) // _SUBLANE * _SUBLANE)
    tm = min(tm, 2048)
    # For large M keep >= ~8 grid steps so "parallel" can split across the
    # two TensorCores on v7x (costs nothing on single-TC v5e/v6e).
    if M > 8 * 512:
        tm = min(tm, max(512, _round_up(pl.cdiv(M, 8), _SUBLANE)))
    if M <= tm:
        return _round_up(M, _SUBLANE)
    return tm


def pe_forward(x, P, *, tm=None, out_dtype=None):
    """x: (n_blocks, B, d), P: (d, F) -> (n_blocks, B, 2F)."""
    n_blocks, B, d = x.shape
    dP, F = P.shape
    assert d == dP
    if out_dtype is None:
        out_dtype = x.dtype
    out_itemsize = jnp.dtype(out_dtype).itemsize

    M = n_blocks * B
    x2 = x.reshape(M, d)

    # Lane-align F so both output halves are dense, aligned 128-lane stores.
    Fp = _round_up(F, _LANE)
    P_in = P if Fp == F else jnp.pad(P, ((0, 0), (0, Fp - F)))

    if tm is None:
        tm = _pick_tm(M, d, Fp, out_itemsize)
    tm = max(_SUBLANE, _round_up(tm, _SUBLANE))

    # Ragged M: pad rows up to a multiple of tm (sliced off afterwards).
    M_pad = _round_up(M, tm)
    if M_pad != M:
        x2 = jnp.pad(x2, ((0, M_pad - M), (0, 0)))
    grid = (M_pad // tm,)

    out2 = pl.pallas_call(
        pe_kernel,
        out_shape=jax.ShapeDtypeStruct((M_pad, 2 * Fp), out_dtype),
        grid_spec=pltpu.PrefetchScalarGridSpec(
            num_scalar_prefetch=0,
            grid=grid,
            in_specs=[
                pl.BlockSpec((tm, d), lambda i: (i, 0)),
                pl.BlockSpec((d, Fp), lambda i: (0, 0)),
            ],
            out_specs=pl.BlockSpec((tm, 2 * Fp), lambda i: (i, 0)),
        ),
        compiler_params=pltpu.CompilerParams(
            dimension_semantics=("parallel",),
            vmem_limit_bytes=32 * 1024 * 1024,
        ),
    )(x2, P_in)

    # Drop row padding, then drop lane padding from each half.  When M_pad==M
    # and Fp==F these are all metadata-only reshapes/slices.
    out = out2[:M].reshape(M, 2, Fp)[:, :, :F].reshape(n_blocks, B, 2 * F)
    return out


def pe_reference(x, P):
    x_ = jnp.einsum("nbd,df->nbf", x, P)
    return jnp.concatenate([jnp.sin(x_), jnp.cos(x_)], axis=-1)


if __name__ == "__main__":
    key = jax.random.PRNGKey(0)
    k_x, k_p = jax.random.split(key)

    n_blocks, B, d, F = 2, 8, 4, 32
    x = jax.random.normal(k_x, (n_blocks, B, d), dtype=jnp.float32)
    # Deterministic "Gaussian random features" style encoding matrix.
    P = jax.random.normal(k_p, (d, F), dtype=jnp.float32)

    out = pe_forward(x, P)
    out = jax.block_until_ready(out)

    ref = pe_reference(x, P)
    assert out.shape == (n_blocks, B, 2 * F), out.shape
    assert jnp.allclose(out, ref, atol=1e-5, rtol=1e-5), "mismatch vs reference"

    print("KERNEL_OK")
</pallas_src>

<mosaic_0001>
module attributes {stable_mosaic.version = 11 : i64} {
  func.func @pe_kernel(%arg0: i32, %arg1: memref<16x4xf32, #tpu.memory_space<vmem>>, %arg2: memref<4x128xf32, #tpu.memory_space<vmem>>, %arg3: memref<16x256xf32, #tpu.memory_space<vmem>>) attributes {dimension_semantics = [#tpu.dimension_semantics<parallel>], iteration_bounds = array<i64: 1>, scalar_prefetch = 0 : i64, scratch_operands = 0 : i64, tpu.core_type = #tpu.core_type<tc>, window_params = [{transform_indices = @transform_0, window_bounds = array<i64: 16, 4>}, {pipeline_mode = #tpu.pipeline_mode<synchronous>, transform_indices = @transform_1, window_bounds = array<i64: 4, 128>}, {transform_indices = @transform_2, window_bounds = array<i64: 16, 256>}]} {
    %c0 = arith.constant 0 : index
    %c0_0 = arith.constant 0 : index
    %0 = vector.load %arg1[%c0, %c0_0] : memref<16x4xf32, #tpu.memory_space<vmem>>, vector<16x4xf32>
    %c0_1 = arith.constant 0 : index
    %c0_2 = arith.constant 0 : index
    %1 = vector.load %arg2[%c0_1, %c0_2] : memref<4x128xf32, #tpu.memory_space<vmem>>, vector<4x128xf32>
    %cst = arith.constant dense<0.000000e+00> : vector<16x128xf32>
    %2 = tpu.matmul %0, %1, %cst {dimension_numbers = #tpu.dot_dimension_numbers<[1], [0], [0], [1], [0, 0, 1, 1], [], []>} : vector<16x4xf32>, vector<4x128xf32>, vector<16x128xf32> -> vector<16x128xf32>
    %3 = math.sin %2 : vector<16x128xf32>
    %c0_3 = arith.constant 0 : index
    %c0_4 = arith.constant 0 : index
    %4 = vector.load %arg3[%c0_3, %c0_4] : memref<16x256xf32, #tpu.memory_space<vmem>>, vector<16x128xf32>
    tpu.vector_store %arg3[%c0_3, %c0_4], %3 {strides = array<i32>} : memref<16x256xf32, #tpu.memory_space<vmem>>, vector<16x128xf32>,
    %5 = math.cos %2 : vector<16x128xf32>
    %c0_5 = arith.constant 0 : index
    %c128 = arith.constant 128 : index
    %6 = vector.load %arg3[%c0_5, %c128] : memref<16x256xf32, #tpu.memory_space<vmem>>, vector<16x128xf32>
    tpu.vector_store %arg3[%c0_5, %c128], %5 {strides = array<i32>} : memref<16x256xf32, #tpu.memory_space<vmem>>, vector<16x128xf32>,
    return
  }
  func.func @transform_0(%arg0: i32) -> (i32, i32) {
    %c0_i32 = arith.constant 0 : i32
    %c0_i32_0 = arith.constant 0 : i32
    return %arg0, %c0_i32 : i32, i32
  }
  func.func @transform_1(%arg0: i32) -> (i32, i32) {
    %c0_i32 = arith.constant 0 : i32
    %c0_i32_0 = arith.constant 0 : i32
    %c0_i32_1 = arith.constant 0 : i32
    return %c0_i32, %c0_i32_0 : i32, i32
  }
  func.func @transform_2(%arg0: i32) -> (i32, i32) {
    %c0_i32 = arith.constant 0 : i32
    %c0_i32_0 = arith.constant 0 : i32
    return %arg0, %c0_i32 : i32, i32
  }
}

</mosaic_0001>

<bundles_post_ra>
// kernel: tpu_custom_call.1
= control target key start
LH: loop header
LB: loop body
LE: loop exit
PB: predicated region body
PF: predicated region fallthrough
CT: control target
= control target key end

     0   :  { %vm22_vm0 = vcmask 1043456   ;;  %vm15_vm1 = vcmask 31744   ;;  %s961_s0 = inlined_call_operand.vmem [shape: f32[16,4], index: 0, kind: input, shape index: {}]   ;;  %s962_s1 = inlined_call_operand.vmem [shape: f32[4,128], index: 1, kind: input, shape index: {}]   ;;  %s963_s2 = inlined_call_operand.hbm [shape: f32[16,256], index: 2, kind: output, shape index: {}]  }
   0x1   :  { %v14_v0 = vld [vmem:[%s962_s1] sm:$0xf]  ;;  %v13_v2 = vld [vmem:[%s961_s0 + $0x8] sm:$0xff] }
   0x2   :  { %v12_v1 = vld [vmem:[%s961_s0] sm:$0xff]  ;;  %689 = vmatpush.msk.msra.mxu0 %vm22_vm0, %v14_v0  ;;  %704 = vmatpush.msk.msra.mxu1 %vm22_vm0, %v14_v0 }
   0x3   :  { %7 = vsyncpa [#allocation3], 0  ;;  %690 = vmatmul.msk.f32.vlgmr.msra.gmra.mxu0 %vm15_vm1, %v12_v1  ;;  %691 = vmatmul.msk.f32.vlgmr.msra.gmra.mxu1 %vm15_vm1, %v13_v2  ;;  %v741_v28 = vmov 683565275   ;;  %v742_v30 = vmov 2475754826  }
   0x4   :  { %v743_v34 = vmov 2131351028   ;;  %v744_v37 = vmov 2102212464   ;;  %v745_v40 = vmov 920167782  }
   0x5   :  { %v746_v43 = vmov 1326507024   ;;  %s748_s0 = smov [#allocation2]   ;;  %s677_s17 = sshll.u32 %s963_s2, 4  ;;  %s678_s17 = int_to_ptr.hbm [resolvable:$true] %s677_s17 }
   0x6   :  { %s675_s1 = sshll.u32 %s748_s0, 4  ;;  %s749_s18 = smov 256   ;;  %s676_s1 = int_to_ptr.vmem [resolvable:$true] %s675_s1 }
   0x7   :  { %s750_s2 = smov 16  }
  0x80   :  { %v775_v3 = vpop.f32.mrf.mxu0  ;;  %v777_v4 = vpop.f32.mrf.mxu1 }
  0x81   :  { %v49_v5 = vand.u32 2147483647, %v775_v3  ;;  %v52_v6 = vand.u32 2139095040, %v775_v3  ;;  %v204_v7 = vand.u32 2147483647, %v777_v4  ;;  %v207_v8 = vand.u32 2139095040, %v777_v4 }
  0x83   :  { %v53_v9 = vshrl.u32 %v52_v6, 23  ;;  %v56_v10 = vand.u32 8388607, %v49_v5  ;;  %v208_v11 = vshrl.u32 %v207_v8, 23  ;;  %v211_v14 = vand.u32 8388607, %v204_v7 }
  0x85   :  { %v692_v12 = vadd.s32 4294967169, %v53_v9  ;;  %v57_v13 = vor.u32 8388608, %v56_v10  ;;  %v695_v15 = vadd.s32 4294967169, %v208_v11  ;;  %v212_v19 = vor.u32 8388608, %v211_v14 }
  0x87   :  { %v59_v16 = vadd.s32 1, %v692_v12  ;;  %v214_v17 = vadd.s32 1, %v695_v15  ;;  %v787_v18 = vshll.u32 %v57_v13, 8  ;;  %v794_v26 = vshll.u32 %v212_v19, 8 }
  0x89   :  { %vm60_vm2 = vcmp.gt.s32.totalorder %v59_v16, 0  ;;  %vm215_vm3 = vcmp.gt.s32.totalorder %v214_v17, 0  ;;  %v790_v24 = vand.u32 65535, %v787_v18  ;;  %v99_v32 = vshrl.u32 %v787_v18, 16 }
  0x8a   :  { %v61_v20 = vsel %vm60_vm2, %v59_v16, 0  ;;  %v216_v22 = vsel %vm215_vm3, %v214_v17, 0 }
  0x8b   :  { %v63_v21 = vand.u32 31, %v61_v20  ;;  %v792_v25 = vand.u32 31, %v216_v22  ;;  %v796_v27 = vshrl.u32 %v61_v20, 5  ;;  %v834_v11 = vshrl.u32 %v216_v22, 5 }
  0x8d   :  { %v64_v23 = vsub.s32 32, %v63_v21  ;;  %v66_v29 = vshll.u32 %v741_v28, %v63_v21  ;;  %v69_v31 = vshll.u32 %v742_v30, %v63_v21  ;;  %v72_v36 = vshll.u32 %v743_v34, %v63_v21 }
  0x8e   :  { %v75_v39 = vshll.u32 %v744_v37, %v63_v21  ;;  %v78_v42 = vshll.u32 %v745_v40, %v63_v21  ;;  %v806_v48 = vsub.s32 32, %v792_v25  ;;  %vm81_vm4 = vcmp.lt.s32.totalorder %v796_v27, 1 }
  0x8f   :  { %v67_v33 = vshrl.u32 %v742_v30, %v64_v23  ;;  %v70_v35 = vshrl.u32 %v743_v34, %v64_v23  ;;  %v73_v38 = vshrl.u32 %v744_v37, %v64_v23  ;;  %v76_v41 = vshrl.u32 %v745_v40, %v64_v23 }
  0x90   :  { %v79_v44 = vshrl.u32 %v746_v43, %v64_v23  ;;  %vm82_vm5 = vcmp.lt.s32.totalorder %v796_v27, 2  ;;  %v65_v51 = vshrl.u32 %v741_v28, %v64_v23  ;;  %vm84_vm6 = vcmp.lt.s32.totalorder %v796_v27, 4 }
  0x91   :  { %v68_v45 = vor.u32 %v67_v33, %v66_v29  ;;  %v71_v46 = vor.u32 %v70_v35, %v69_v31  ;;  %v74_v47 = vor.u32 %v73_v38, %v72_v36  ;;  %v77_v49 = vor.u32 %v76_v41, %v75_v39 }
  0x92   :  { %v80_v50 = vor.u32 %v79_v44, %v78_v42  ;;  %vm83_vm7 = vcmp.lt.s32.totalorder %v796_v27, 3  ;;  %v221_v56 = vshll.u32 %v741_v28, %v792_v25  ;;  %v222_v60 = vshrl.u32 %v742_v30, %v806_v48 }
  0x93   :  { %v89_v52 = vsel %vm81_vm4, %v68_v45, %v71_v46  ;;  %v93_v53 = vsel %vm81_vm4, %v71_v46, %v74_v47  ;;  %v90_v54 = vsel %vm84_vm6, %v77_v49, 920167782  ;;  %v86_v57 = vsel %vm84_vm6, %v74_v47, 2102212464 }
  0x94   :  { %v94_v55 = vsel %vm84_vm6, %v80_v50, 1326507024  ;;  %v91_v58 = vsel %vm83_vm7, %v74_v47, %v90_v54  ;;  %v224_v63 = vshll.u32 %v742_v30, %v792_v25  ;;  %v225_v0 = vshrl.u32 %v743_v34, %v806_v48 }
  0x95   :  { %v95_v59 = vsel %vm83_vm7, %v77_v49, %v94_v55  ;;  %v92_v61 = vsel %vm82_vm5, %v89_v52, %v91_v58  ;;  %v85_v9 = vsel %vm81_vm4, %v65_v51, %v68_v45  ;;  %v87_v10 = vsel %vm83_vm7, %v71_v46, %v86_v57 }
  0x96   :  { %v96_v62 = vsel %vm82_vm5, %v93_v53, %v95_v59  ;;  %v122_v6 = vand.u32 65535, %v92_v61  ;;  %v123_v8 = vshrl.u32 %v92_v61, 16  ;;  %v836_v12 = vor.u32 %v222_v60, %v221_v56 }
  0x97   :  { %v100_v1 = vand.u32 65535, %v96_v62  ;;  %v101_v2 = vshrl.u32 %v96_v62, 16  ;;  %v839_v15 = vor.u32 %v225_v0, %v224_v63  ;;  %v228_v16 = vshrl.u32 %v744_v37, %v806_v48 }
  0x98   :  { %v125_v19 = vmul.u32 %v123_v8, %v790_v24  ;;  %v126_v20 = vmul.u32 %v122_v6, %v99_v32  ;;  %v227_v21 = vshll.u32 %v743_v34, %v792_v25  ;;  %v124_v29 = vmul.u32 %v122_v6, %v790_v24 }
  0x99   :  { %v103_v13 = vmul.u32 %v101_v2, %v790_v24  ;;  %v104_v14 = vmul.u32 %v100_v1, %v99_v32  ;;  %v102_v17 = vmul.u32 %v100_v1, %v790_v24  ;;  %v105_v23 = vmul.u32 %v101_v2, %v99_v32 }
  0x9a   :  { %v127_v30 = vmul.u32 %v123_v8, %v99_v32  ;;  %v128_v36 = vshll.u32 %v125_v19, 16  ;;  %v130_v39 = vshll.u32 %v126_v20, 16  ;;  %v847_v41 = vor.u32 %v228_v16, %v227_v21 }
  0x9b   :  { %v106_v22 = vshll.u32 %v103_v13, 16  ;;  %v107_v31 = vshrl.u32 %v103_v13, 16  ;;  %v108_v33 = vshll.u32 %v104_v14, 16  ;;  %v109_v35 = vshrl.u32 %v104_v14, 16 }
  0x9c   :  { %v747_v42 = vmov 0   ;;  %vm132_vm9 = vc.u32 %v124_v29, %v128_v36  ;;  %v134_v45 = vadd.s32 %v128_v36, %v124_v29  ;;  %v231_v34 = vshrl.u32 %v745_v40, %v806_v48 }
  0x9d   :  { %vm110_vm8 = vc.u32 %v102_v17, %v106_v22  ;;  %v112_v38 = vadd.s32 %v106_v22, %v102_v17  ;;  %v133_v24 = vsel %vm132_vm9, 1, %v747_v42  ;;  %v230_v32 = vshll.u32 %v744_v37, %v792_v25 }
  0x9e   :  { %v111_v44 = vsel %vm110_vm8, 1, %v747_v42  ;;  %v135_v49 = vadd.s32 %v133_v24, %v127_v30  ;;  %vm136_vm11 = vc.u32 %v134_v45, %v130_v39  ;;  %v233_v50 = vshll.u32 %v745_v40, %v792_v25 }
  0x9f   :  { %v113_v46 = vadd.s32 %v111_v44, %v105_v23  ;;  %vm114_vm10 = vc.u32 %v112_v38, %v108_v33  ;;  %v137_v52 = vsel %vm136_vm11, 1, %v747_v42  ;;  %v232_v53 = vor.u32 %v231_v34, %v230_v32 }
  0xa0   :  { %v115_v47 = vsel %vm114_vm10, 1, %v747_v42  ;;  %v234_v54 = vshrl.u32 %v746_v43, %v806_v48  ;;  %v129_v55 = vshrl.u32 %v125_v19, 16  ;;  %v131_v56 = vshrl.u32 %v126_v20, 16 }
  0xa1   :  { %v117_v51 = vadd.s32 %v115_v47, %v113_v46  ;;  %v861_v57 = vadd.s32 %v134_v45, %v130_v39  ;;  %v139_v58 = vadd.s32 %v137_v52, %v135_v49  ;;  %vm236_vm12 = vcmp.lt.s32.totalorder %v834_v11, 1 }
  0xa2   :  { %v235_v59 = vor.u32 %v234_v54, %v233_v50  ;;  %vm239_vm13 = vcmp.lt.s32.totalorder %v834_v11, 4  ;;  %vm238_vm14 = vcmp.lt.s32.totalorder %v834_v11, 3  ;;  %v244_v25 = vsel %vm236_vm12, %v836_v12, %v839_v15 }
  0xa3   :  { %v118_v37 = vadd.s32 %v117_v51, %v107_v31  ;;  %v140_v60 = vadd.s32 %v139_v58, %v129_v55  ;;  %v245_v40 = vsel %vm239_vm13, %v232_v53, 920167782  ;;  %vm237_vm15 = vcmp.lt.s32.totalorder %v834_v11, 2 }
  0xa4   :  { %v246_v61 = vsel %vm238_vm14, %v847_v41, %v245_v40  ;;  %v248_v62 = vsel %vm236_vm12, %v839_v15, %v847_v41  ;;  %v88_v63 = vsel %vm82_vm5, %v85_v9, %v87_v10  ;;  %v249_v2 = vsel %vm239_vm13, %v235_v59, 1326507024 }
  0xa5   :  { %v872_v43 = vadd.s32 %v118_v37, %v109_v35  ;;  %v141_v0 = vadd.s32 %v140_v60, %v131_v56  ;;  %v247_v1 = vsel %vm237_vm15, %v244_v25, %v246_v61  ;;  %v250_v6 = vsel %vm238_vm14, %v232_v53, %v249_v2 }
  0xa6   :  { %v253_v8 = vand.u32 65535, %v794_v26  ;;  %v277_v13 = vand.u32 65535, %v247_v1  ;;  %v251_v27 = vsel %vm237_vm15, %v248_v62, %v250_v6  ;;  %v254_v9 = vshrl.u32 %v794_v26, 16 }
  0xa7   :  { %vm144_vm0 = vc.u32 %v872_v43, %v861_v57  ;;  %v145_v14 = vadd.s32 1, %v141_v0  ;;  %v278_v10 = vshrl.u32 %v247_v1, 16  ;;  %v142_v16 = vmul.u32 %v787_v18, %v88_v63 }
  0xa8   :  { %v255_v17 = vand.u32 65535, %v251_v27  ;;  %v256_v19 = vshrl.u32 %v251_v27, 16  ;;  %v281_v23 = vmul.u32 %v277_v13, %v254_v9  ;;  %v279_v31 = vmul.u32 %v277_v13, %v253_v8 }
  0xa9   :  { %v146_v20 = vsel %vm144_vm0, %v145_v14, %v141_v0  ;;  %v280_v21 = vmul.u32 %v278_v10, %v253_v8  ;;  %v282_v33 = vmul.u32 %v278_v10, %v254_v9  ;;  %v241_v51 = vsel %vm239_vm13, %v847_v41, 2102212464 }
  0xaa   :  { %v147_v22 = vadd.s32 %v146_v20, %v142_v16  ;;  %v258_v29 = vmul.u32 %v256_v19, %v253_v8  ;;  %v259_v30 = vmul.u32 %v255_v17, %v254_v9  ;;  %v257_v38 = vmul.u32 %v255_v17, %v253_v8 }
  0xab   :  { %v283_v35 = vshll.u32 %v280_v21, 16  ;;  %v260_v39 = vmul.u32 %v256_v19, %v254_v9  ;;  %v285_v34 = vshll.u32 %v281_v23, 16  ;;  %v220_v53 = vshrl.u32 %v741_v28, %v806_v48 }
  0xac   :  { %v148_v36 = vadd.s32 536870912, %v147_v22  ;;  %v261_v44 = vshll.u32 %v258_v29, 16  ;;  %v263_v45 = vshll.u32 %v259_v30, 16  ;;  %v242_v41 = vsel %vm238_vm14, %v839_v15, %v241_v51 }
  0xad   :  { %vm287_vm1 = vc.u32 %v279_v31, %v283_v35  ;;  %v289_v46 = vadd.s32 %v283_v35, %v279_v31  ;;  %v240_v59 = vsel %vm236_vm12, %v220_v53, %v836_v12  ;;  %v262_v60 = vshrl.u32 %v258_v29, 16 }
  0xae   :  { %v897_v18 = vshrl.u32 %v148_v36, 30  ;;  %vm265_vm2 = vc.u32 %v257_v38, %v261_v44  ;;  %v267_v24 = vadd.s32 %v261_v44, %v257_v38  ;;  %v288_v32 = vsel %vm287_vm1, 1, %v747_v42 }
  0xaf   :  { %v266_v47 = vsel %vm265_vm2, 1, %v747_v42  ;;  %v290_v49 = vadd.s32 %v288_v32, %v282_v33  ;;  %vm291_vm3 = vc.u32 %v289_v46, %v285_v34  ;;  %v284_v25 = vshrl.u32 %v280_v21, 16 }
  0xb0   :  { %v150_v50 = vshll.u32 %v897_v18, 30  ;;  %v268_v52 = vadd.s32 %v266_v47, %v260_v39  ;;  %vm269_vm4 = vc.u32 %v267_v24, %v263_v45  ;;  %v292_v55 = vsel %vm291_vm3, 1, %v747_v42 }
  0xb1   :  { %v270_v54 = vsel %vm269_vm4, 1, %v747_v42  ;;  %v294_v37 = vadd.s32 %v292_v55, %v290_v49  ;;  %v264_v28 = vshrl.u32 %v259_v30, 16  ;;  %v286_v61 = vshrl.u32 %v281_v23, 16 }
  0xb2   :  { %v151_v56 = vsub.s32 %v147_v22, %v150_v50  ;;  %v272_v58 = vadd.s32 %v270_v54, %v268_v52  ;;  %v243_v63 = vsel %vm237_vm15, %v240_v59, %v242_v41  ;;  %v293_v2 = vadd.s32 %v289_v46, %v285_v34 }
  0xb3   :  { %v295_v62 = vadd.s32 %v294_v37, %v284_v25  ;;  %v297_v15 = vmul.u32 %v794_v26, %v243_v63  ;;  %v143_v9 = vadd.s32 %v861_v57, %v872_v43  ;;  %vm51_vm9 = vcmp.lt.s32.totalorder %v775_v3, 0 }
  0xb4   :  { %vm152_vm5 = vcmp.lt.s32.totalorder %v151_v56, 0  ;;  %v153_v40 = vsub.s32 0, %v151_v56  ;;  %v273_v48 = vadd.s32 %v272_v58, %v262_v60  ;;  %v173_v39 = vsub.s32 4, %v897_v18 }
  0xb5   :  { %v296_v12 = vadd.s32 %v295_v62, %v286_v61  ;;  %vm927_vm10 = vcmp.le.f32.partialorder %v49_v5, 0.7853982  ;;  %vm206_vm12 = vcmp.lt.s32.totalorder %v777_v4, 0  ;;  %vm940_vm15 = vcmp.le.f32.partialorder %v204_v7, 0.7853982 }
  0xb6   :  { %v154_v42 = vsel %vm152_vm5, %v153_v40, %v151_v56  ;;  %v274_v1 = vadd.s32 %v273_v48, %v264_v28  ;;  %v174_v32 = vsel %vm51_vm9, %v173_v39, %v897_v18  ;;  %vm192_vm4 = vweird.f32 %v775_v3 }
  0xb7   :  { %v155_v0 = vclz %v154_v42  ;;  %v300_v8 = vadd.s32 1, %v296_v12 }
  0xb8   :  { %vm299_vm6 = vc.u32 %v274_v1, %v293_v2  ;;  %v298_v51 = vadd.s32 %v293_v2, %v274_v1 }
  0xb9   :  { %v693_v6 = vadd.s32 4294967294, %v155_v0  ;;  %v301_v13 = vsel %vm299_vm6, %v300_v8, %v296_v12 }
  0xba   :  { %v302_v27 = vadd.s32 %v301_v13, %v297_v15 }
  0xbb   :  { %vm694_vm7 = vcmp.lt.s32.totalorder %v693_v6, 0 }
  0xbc   :  { %v158_v14 = vsel %vm694_vm7, 0, %v693_v6  ;;  %v303_v11 = vadd.s32 536870912, %v302_v27 }
  0xbd   :  { %v159_v10 = vsub.s32 32, %v158_v14  ;;  %v163_v16 = vsub.s32 4294967266, %v158_v14  ;;  %v160_v17 = vshll.u32 %v151_v56, %v158_v14  ;;  %v176_v56 = vsel %vm927_vm10, 0, %v174_v32 }
  0xbe   :  { %v920_v21 = vshrl.u32 %v303_v11, 30  ;;  %v193_v28 = vadd.s32 3, %v176_v56  ;;  %v505_v42 = vand.u32 3, %v176_v56 }
  0xbf   :  { %v161_v19 = vshrl.u32 %v143_v9, %v159_v10  ;;  %v164_v20 = vadd.s32 127, %v163_v16 }
  0xc0   :  { %v305_v29 = vshll.u32 %v920_v21, 30  ;;  %v194_v12 = vand.u32 3, %v193_v28  ;;  %vm506_vm13 = vcmp.lt.s32.totalorder %v505_v42, 2  ;;  %vm507_vm14 = vcmp.eq.s32.totalorder %v505_v42, 0 }
  0xc1   :  { %v162_v23 = vor.u32 %v161_v19, %v160_v17  ;;  %v165_v22 = vshll.u32 %v164_v20, 23  ;;  %vm510_vm2 = vcmp.eq.s32.totalorder %v505_v42, 2  ;;  %v328_v16 = vsub.s32 4, %v920_v21 }
  0xc2   :  { %v306_v30 = vsub.s32 %v302_v27, %v305_v29  ;;  %vm195_vm0 = vcmp.lt.s32.totalorder %v194_v12, 2  ;;  %vm199_vm1 = vcmp.eq.s32.totalorder %v194_v12, 2  ;;  %vm196_vm3 = vcmp.eq.s32.totalorder %v194_v12, 0 }
  0xc3   :  { %v166_v26 = vor.u32 4788187, %v165_v22  ;;  %v169_v33 = vcvt.s32.f32 %v162_v23 }
  0xc4   :  { %vm307_vm8 = vcmp.lt.s32.totalorder %v306_v30, 0  ;;  %v308_v35 = vsub.s32 0, %v306_v30 }
  0xc5   :  { %v167_v31 = vand.u32 2147483647, %v166_v26 }
  0xc6   :  { %v309_v57 = vsel %vm307_vm8, %v308_v35, %v306_v30 }
  0xc7   :  { %v170_v36 = vmul.f32 %v169_v33, %v167_v31  ;;  %v310_v38 = vclz %v309_v57  ;;  %v329_v33 = vsel %vm206_vm12, %v328_v16, %v920_v21 }
  0xc8   :  { %v331_v57 = vsel %vm940_vm15, 0, %v329_v33 }
  0xc9   :  { %v171_v43 = vxor.u32 2147483648, %v170_v36  ;;  %v696_v34 = vadd.s32 4294967294, %v310_v38  ;;  %v348_v44 = vadd.s32 3, %v331_v57  ;;  %v659_v32 = vand.u32 3, %v331_v57 }
  0xcb   :  { %v172_v45 = vsel %vm51_vm9, %v171_v43, %v170_v36  ;;  %vm697_vm11 = vcmp.lt.s32.totalorder %v696_v34, 0  ;;  %vm660_vm5 = vcmp.lt.s32.totalorder %v659_v32, 2  ;;  %vm661_vm6 = vcmp.eq.s32.totalorder %v659_v32, 0 }
  0xcc   :  { %v175_v46 = vsel %vm927_vm10, %v775_v3, %v172_v45  ;;  %v313_v47 = vsel %vm697_vm11, 0, %v696_v34  ;;  %vm664_vm10 = vcmp.eq.s32.totalorder %v659_v32, 2  ;;  %vm347_vm11 = vweird.f32 %v777_v4 }
  0xcd   :  { %v177_v24 = vmul.f32 %v175_v46, %v175_v46  ;;  %v314_v52 = vsub.s32 32, %v313_v47  ;;  %v318_v53 = vsub.s32 4294967266, %v313_v47  ;;  %v315_v58 = vshll.u32 %v306_v30, %v313_v47 }
  0xce   :  { %v349_v47 = vand.u32 3, %v348_v44 }
  0xcf   :  { %v178_v49 = vmul.f32 -0.001358992, %v177_v24  ;;  %v185_v50 = vmul.f32 -0.00019511016, %v177_v24  ;;  %v316_v55 = vshrl.u32 %v298_v51, %v314_v52  ;;  %v319_v37 = vadd.s32 127, %v318_v53 }
  0xd0   :  { %vm350_vm7 = vcmp.lt.s32.totalorder %v349_v47, 2  ;;  %vm351_vm8 = vcmp.eq.s32.totalorder %v349_v47, 0  ;;  %vm354_vm9 = vcmp.eq.s32.totalorder %v349_v47, 2 }
  0xd1   :  { %v179_v5 = vadd.f32 0.041655596, %v178_v49  ;;  %v186_v54 = vadd.f32 0.008332121, %v185_v50  ;;  %v317_v60 = vor.u32 %v316_v55, %v315_v58  ;;  %v320_v25 = vshll.u32 %v319_v37, 23 }
  0xd3   :  { %v180_v59 = vmul.f32 %v179_v5, %v177_v24  ;;  %v187_v41 = vmul.f32 %v186_v54, %v177_v24  ;;  %v321_v48 = vor.u32 4788187, %v320_v25  ;;  %v324_v0 = vcvt.s32.f32 %v317_v60 }
  0xd5   :  { %v181_v40 = vadd.f32 -0.4999988, %v180_v59  ;;  %v188_v18 = vadd.f32 -0.16666654, %v187_v41  ;;  %v322_v63 = vand.u32 2147483647, %v321_v48 }
  0xd7   :  { %v182_v61 = vmul.f32 %v181_v40, %v177_v24  ;;  %v189_v62 = vmul.f32 %v188_v18, %v177_v24  ;;  %v325_v6 = vmul.f32 %v324_v0, %v322_v63 }
  0xd9   :  { %v183_v1 = vadd.f32 1.0, %v182_v61  ;;  %v190_v2 = vadd.f32 1.0, %v189_v62  ;;  %v326_v14 = vxor.u32 2147483648, %v325_v6 }
  0xdb   :  { %v191_v8 = vmul.f32 %v190_v2, %v175_v46  ;;  %v200_v15 = vxor.u32 2147483648, %v183_v1  ;;  %v327_v10 = vsel %vm206_vm12, %v326_v14, %v325_v6 }
  0xdc   :  { %v330_v7 = vsel %vm940_vm15, %v777_v4, %v327_v10 }
  0xdd   :  { %v197_v27 = vxor.u32 2147483648, %v191_v8  ;;  %v201_v9 = vsel %vm199_vm1, %v200_v15, %v191_v8  ;;  %v512_v19 = vsel %vm510_vm2, %v200_v15, %v191_v8  ;;  %v332_v22 = vmul.f32 %v330_v7, %v330_v7 }
  0xdf   :  { %v198_v11 = vsel %vm196_vm3, %v183_v1, %v197_v27  ;;  %v509_v17 = vsel %vm507_vm14, %v183_v1, %v197_v27  ;;  %v333_v30 = vmul.f32 -0.001358992, %v332_v22  ;;  %v340_v31 = vmul.f32 -0.00019511016, %v332_v22 }
  0xe0   :  { %v202_v20 = vsel %vm195_vm0, %v198_v11, %v201_v9  ;;  %v513_v23 = vsel %vm506_vm13, %v509_v17, %v512_v19 }
  0xe1   :  { %v203_v29 = vsel %vm192_vm4, nan, %v202_v20  ;;  %v514_v26 = vsel %vm192_vm4, nan, %v513_v23  ;;  %v334_v35 = vadd.f32 0.041655596, %v333_v30  ;;  %v341_v36 = vadd.f32 0.008332121, %v340_v31 }
  0xe2   :  { %359 = vst [vmem:[#allocation2] sm:$0xff] %v203_v29 }
  0xe3   :  { %669 = vst [vmem:[#allocation2 + $0x8] sm:$0xff] %v514_v26  ;;  %v335_v3 = vmul.f32 %v334_v35, %v332_v22  ;;  %v342_v43 = vmul.f32 %v341_v36, %v332_v22 }
  0xe5   :  { %v336_v38 = vadd.f32 -0.4999988, %v335_v3  ;;  %v343_v39 = vadd.f32 -0.16666654, %v342_v43 }
  0xe7   :  { %v337_v45 = vmul.f32 %v336_v38, %v332_v22  ;;  %v344_v34 = vmul.f32 %v343_v39, %v332_v22 }
  0xe9   :  { %v338_v46 = vadd.f32 1.0, %v337_v45  ;;  %v345_v24 = vadd.f32 1.0, %v344_v34 }
  0xeb   :  { %v346_v49 = vmul.f32 %v345_v24, %v330_v7  ;;  %v355_v50 = vxor.u32 2147483648, %v338_v46 }
  0xed   :  { %v352_v51 = vxor.u32 2147483648, %v346_v49  ;;  %v356_v52 = vsel %vm354_vm9, %v355_v50, %v346_v49  ;;  %v666_v5 = vsel %vm664_vm10, %v355_v50, %v346_v49 }
  0xef   :  { %v353_v21 = vsel %vm351_vm8, %v338_v46, %v352_v51  ;;  %v663_v53 = vsel %vm661_vm6, %v338_v46, %v352_v51 }
  0xf0   :  { %v357_v54 = vsel %vm350_vm7, %v353_v21, %v356_v52  ;;  %v667_v55 = vsel %vm660_vm5, %v663_v53, %v666_v5 }
  0xf1   :  { %v358_v56 = vsel %vm347_vm11, nan, %v357_v54  ;;  %v668_v58 = vsel %vm347_vm11, nan, %v667_v55 }
  0xf2   :  { %360 = vst [vmem:[#allocation2 + $0x10] sm:$0xff] %v358_v56 }
  0xf3   :  { %670 = vst [vmem:[#allocation2 + $0x18] sm:$0xff] %v668_v58 }
  0xf4   :  { %683 = dma.vmem_to_hbm [thread:$0]  %s676_s1, 512, %s678_s17, [#allocation3], %s749_s18, %s749_s18, %s750_s2  }
  0xf5   :  { %739 = dma.done.wait [#allocation3], 512  }
  0xf6   :  { %740 = vsyncadd [#allocation3], 4294966784 }
  0xf7   :  { %688 = vsyncpa [#allocation3], 1 }

</bundles_post_ra>
